<compile_context>
chip_gen: v6e
topology: v6e:2x2x1
jax: 0.10.0
libtpu: 0.0.40
codegen_flags: <defaults>
</compile_context>

<pallas_src>
import functools

import jax
import jax.numpy as jnp
from jax.experimental import pallas as pl
from jax.experimental.pallas import tpu as pltpu


def _phenotype_classifier_kernel(
    xt_ref,
    w1_ref, b1_ref,
    w2_ref, b2_ref,
    w3_ref, b3_ref,
    wo_ref, bo_ref,
    o_ref,
    *,
    inv_temperature: float,
):
    """One batch tile. xt_ref: (n_latent, TB); o_ref: (P, TB); weights: (out, in)."""
    # Cast the streamed x tile to bf16 in-kernel (VPU work, hidden under the matmuls).
    h = xt_ref[...].astype(jnp.bfloat16)

    # Hidden layers: h <- ReLU(W @ h + b); activations are (hidden, TB) -> batch on lanes.
    h = jnp.dot(w1_ref[...], h, preferred_element_type=jnp.float32)
    h = jnp.maximum(h + b1_ref[...], 0.0).astype(jnp.bfloat16)

    h = jnp.dot(w2_ref[...], h, preferred_element_type=jnp.float32)
    h = jnp.maximum(h + b2_ref[...], 0.0).astype(jnp.bfloat16)

    h = jnp.dot(w3_ref[...], h, preferred_element_type=jnp.float32)
    h = jnp.maximum(h + b3_ref[...], 0.0).astype(jnp.bfloat16)

    # Output projection: (P, TB), lane-dense store.
    logits = jnp.dot(wo_ref[...], h, preferred_element_type=jnp.float32)
    logits = logits + bo_ref[...]

    # clamp(-5, 5) then temperature scaling (precomputed reciprocal -> VPU multiply).
    logits = jnp.clip(logits, -5.0, 5.0)
    o_ref[...] = (logits * inv_temperature).astype(o_ref.dtype)


def _round_up(n: int, m: int) -> int:
    return ((n + m - 1) // m) * m


def prepare_params(raw_params):
    """One-time param prep: bf16 weights in native (out, in) layout, f32 column biases.

    Hoists all per-call .astype work out of the forward function.
    """
    prepped = {}
    for name in ("w1", "w2", "w3", "wo"):
        prepped[name] = raw_params[name].astype(jnp.bfloat16)          # (out, in)
    for name in ("b1", "b2", "b3", "bo"):
        prepped[name] = raw_params[name].reshape(-1, 1).astype(jnp.float32)  # (out, 1)
    return prepped


def _xla_small_batch_forward(x, p, inv_temperature):
    """Fused pure-XLA path: faster than pallas_call fixed overhead at small batch."""
    h = x
    for w, b in ((p["w1"], p["b1"]), (p["w2"], p["b2"]), (p["w3"], p["b3"])):
        h = jnp.maximum(
            jnp.dot(h.astype(jnp.bfloat16), w.T, preferred_element_type=jnp.float32)
            + b.T,
            0.0,
        )
    logits = (
        jnp.dot(h.astype(jnp.bfloat16), p["wo"].T, preferred_element_type=jnp.float32)
        + p["bo"].T
    )
    return (jnp.clip(logits, -5.0, 5.0) * inv_temperature).astype(x.dtype)


def _pick_batch_tile(B: int, block_b: int) -> int:
    """Lane-aligned batch tile; >= 2 grid steps for large B (dual-TC on v7x)."""
    if B <= 128:
        return B  # full-extent block (exempt from the 128-lane divisibility rule)
    tb = min(block_b, _round_up(B, 128))
    if B > 256 and pl.cdiv(B, tb) < 2:
        tb = _round_up(pl.cdiv(B, 2), 128)
    return tb


def phenotype_classifier_forward(
    x, params, *, temperature=1.0, block_b=16384, min_pallas_batch=1024
):
    """PhenotypeClassifier forward.

    x: (B, n_latent) float32.
    params: output of prepare_params() (bf16 (out,in) weights, f32 (out,1) biases).
    Returns (B, P) logits, clamped to [-5, 5] and divided by temperature.
    """
    B, n_latent = x.shape
    P = params["wo"].shape[0]
    inv_temperature = 1.0 / float(temperature)

    if B < min_pallas_batch:
        return _xla_small_batch_forward(x, params, inv_temperature)

    TB = _pick_batch_tile(B, block_b)
    grid = (pl.cdiv(B, TB),)
    # NOTE: tail blocks (B % TB != 0) compute on padded lanes but their writes are
    # clipped by Pallas; rows (lanes) are independent so this is correct.

    # Batch on the lane dim: stream x as (n_latent, B), write the output as (P, B).
    xt = x.T

    kernel = functools.partial(
        _phenotype_classifier_kernel, inv_temperature=inv_temperature
    )

    # Weights/biases: full-extent block, constant index map -> fetched once,
    # VMEM-resident across all batch tiles.
    resident = lambda shape: pl.BlockSpec(shape, lambda i: (0, 0))

    out_t = pl.pallas_call(
        kernel,
        out_shape=jax.ShapeDtypeStruct((P, B), x.dtype),
        grid=grid,
        in_specs=[
            pl.BlockSpec((n_latent, TB), lambda i: (0, i)),
            resident(params["w1"].shape), resident(params["b1"].shape),
            resident(params["w2"].shape), resident(params["b2"].shape),
            resident(params["w3"].shape), resident(params["b3"].shape),
            resident(params["wo"].shape), resident(params["bo"].shape),
        ],
        out_specs=pl.BlockSpec((P, TB), lambda i: (0, i)),
        compiler_params=pltpu.CompilerParams(
            dimension_semantics=("parallel",),
            vmem_limit_bytes=32 * 1024 * 1024,
        ),
    )(
        xt,
        params["w1"], params["b1"],
        params["w2"], params["b2"],
        params["w3"], params["b3"],
        params["wo"], params["bo"],
    )
    return out_t.T  # back to (B, P) to match the module's output layout


def init_params(key, n_latent, classifier_hidden, P):
    """Deterministic synthetic init matching nn.Linear: weight (out, in), bias (out,)."""
    ks = jax.random.split(key, 8)

    def lin(kw, kb, fan_in, fan_out):
        bound = 1.0 / (fan_in ** 0.5)
        w = jax.random.uniform(kw, (fan_out, fan_in), jnp.float32, -bound, bound)
        b = jax.random.uniform(kb, (fan_out,), jnp.float32, -bound, bound)
        return w, b

    w1, b1 = lin(ks[0], ks[1], n_latent, classifier_hidden)
    w2, b2 = lin(ks[2], ks[3], classifier_hidden, classifier_hidden)
    w3, b3 = lin(ks[4], ks[5], classifier_hidden, classifier_hidden)
    wo, bo = lin(ks[6], ks[7], classifier_hidden, P)
    return dict(w1=w1, b1=b1, w2=w2, b2=b2, w3=w3, b3=b3, wo=wo, bo=bo)


def reference_forward(x, raw_params, *, temperature=1.0):
    """Pure-JAX f32 reference of the PyTorch forward."""
    h = x
    for w, b in (
        (raw_params["w1"], raw_params["b1"]),
        (raw_params["w2"], raw_params["b2"]),
        (raw_params["w3"], raw_params["b3"]),
    ):
        h = jnp.maximum(h @ w.T + b, 0.0)
    logits = h @ raw_params["wo"].T + raw_params["bo"]
    return jnp.clip(logits, -5.0, 5.0) / temperature


if __name__ == "__main__":
    # Small shapes consistent with the module: n_latent=16, hidden=32, P=4.
    n_latent, classifier_hidden, P = 16, 32, 4

    key = jax.random.PRNGKey(0)
    kp, k1, k2, k3 = jax.random.split(key, 4)

    raw = init_params(kp, n_latent, classifier_hidden, P)
    params = prepare_params(raw)  # one-time bf16 / f32 param prep

    def check(x, temperature, **kw):
        out = jax.block_until_ready(
            phenotype_classifier_forward(x, params, temperature=temperature, **kw)
        )
        ref = reference_forward(x, raw, temperature=temperature)
        assert out.shape == ref.shape, (out.shape, ref.shape)
        # bf16 MXU operands (f32 accumulation) -> loose tolerance vs the f32 reference.
        assert jnp.allclose(out, ref, atol=5e-2, rtol=5e-2), (
            f"mismatch vs JAX reference: max abs err {jnp.max(jnp.abs(out - ref))}"
        )
        return out

    # 1) Pallas path: batch > 256 is split into >= 2 lane-aligned tiles (dual-TC on v7x).
    x1 = jax.random.normal(k1, (512, n_latent), dtype=jnp.float32)
    check(x1, 1.0, min_pallas_batch=1)

    # 2) Pallas path: ragged batch + small tile -> multiple grid steps + clipped tail block.
    x2 = jax.random.normal(k2, (300, n_latent), dtype=jnp.float32)
    check(x2, 0.5, block_b=128, min_pallas_batch=1)

    # 3) Default small-batch fast path (skips pallas_call; fused XLA expression).
    x3 = jax.random.normal(k3, (8, n_latent), dtype=jnp.float32)
    check(x3, 2.0)

    print("KERNEL_OK")
</pallas_src>

<mosaic_0001>
module attributes {stable_mosaic.version = 11 : i64} {
  func.func @_phenotype_classifier_kernel(%arg0: i32, %arg1: memref<16x256xf32, #tpu.memory_space<vmem>>, %arg2: memref<32x16xbf16, #tpu.memory_space<vmem>>, %arg3: memref<32x1xf32, #tpu.memory_space<vmem>>, %arg4: memref<32x32xbf16, #tpu.memory_space<vmem>>, %arg5: memref<32x1xf32, #tpu.memory_space<vmem>>, %arg6: memref<32x32xbf16, #tpu.memory_space<vmem>>, %arg7: memref<32x1xf32, #tpu.memory_space<vmem>>, %arg8: memref<4x32xbf16, #tpu.memory_space<vmem>>, %arg9: memref<4x1xf32, #tpu.memory_space<vmem>>, %arg10: memref<4x256xf32, #tpu.memory_space<vmem>>) attributes {dimension_semantics = [#tpu.dimension_semantics<parallel>], iteration_bounds = array<i64: 2>, scalar_prefetch = 0 : i64, scratch_operands = 0 : i64, tpu.core_type = #tpu.core_type<tc>, window_params = [{transform_indices = @transform_0, window_bounds = array<i64: 16, 256>}, {pipeline_mode = #tpu.pipeline_mode<synchronous>, transform_indices = @transform_1, window_bounds = array<i64: 32, 16>}, {pipeline_mode = #tpu.pipeline_mode<synchronous>, transform_indices = @transform_2, window_bounds = array<i64: 32, 1>}, {pipeline_mode = #tpu.pipeline_mode<synchronous>, transform_indices = @transform_3, window_bounds = array<i64: 32, 32>}, {pipeline_mode = #tpu.pipeline_mode<synchronous>, transform_indices = @transform_4, window_bounds = array<i64: 32, 1>}, {pipeline_mode = #tpu.pipeline_mode<synchronous>, transform_indices = @transform_5, window_bounds = array<i64: 32, 32>}, {pipeline_mode = #tpu.pipeline_mode<synchronous>, transform_indices = @transform_6, window_bounds = array<i64: 32, 1>}, {pipeline_mode = #tpu.pipeline_mode<synchronous>, transform_indices = @transform_7, window_bounds = array<i64: 4, 32>}, {pipeline_mode = #tpu.pipeline_mode<synchronous>, transform_indices = @transform_8, window_bounds = array<i64: 4, 1>}, {transform_indices = @transform_9, window_bounds = array<i64: 4, 256>}]} {
    %c0 = arith.constant 0 : index
    %c0_0 = arith.constant 0 : index
    %0 = vector.load %arg1[%c0, %c0_0] : memref<16x256xf32, #tpu.memory_space<vmem>>, vector<16x256xf32>
    %1 = arith.truncf %0 : vector<16x256xf32> to vector<16x256xbf16>
    %c0_1 = arith.constant 0 : index
    %c0_2 = arith.constant 0 : index
    %2 = vector.load %arg2[%c0_1, %c0_2] : memref<32x16xbf16, #tpu.memory_space<vmem>>, vector<32x16xbf16>
    %cst = arith.constant dense<0.000000e+00> : vector<32x256xf32>
    %3 = tpu.matmul %2, %1, %cst {dimension_numbers = #tpu.dot_dimension_numbers<[1], [0], [0], [1], [0, 0, 1, 1], [], []>} : vector<32x16xbf16>, vector<16x256xbf16>, vector<32x256xf32> -> vector<32x256xf32>
    %c0_3 = arith.constant 0 : index
    %c0_4 = arith.constant 0 : index
    %4 = vector.load %arg3[%c0_3, %c0_4] : memref<32x1xf32, #tpu.memory_space<vmem>>, vector<32x1xf32>
    %5 = vector.broadcast %4 : vector<32x1xf32> to vector<32x256xf32>
    %6 = arith.addf %3, %5 : vector<32x256xf32>
    %cst_5 = arith.constant 0.000000e+00 : f32
    %7 = vector.broadcast %cst_5 : f32 to vector<32x256xf32>
    %8 = arith.maximumf %6, %7 : vector<32x256xf32>
    %9 = arith.truncf %8 : vector<32x256xf32> to vector<32x256xbf16>
    %c0_6 = arith.constant 0 : index
    %c0_7 = arith.constant 0 : index
    %10 = vector.load %arg4[%c0_6, %c0_7] : memref<32x32xbf16, #tpu.memory_space<vmem>>, vector<32x32xbf16>
    %cst_8 = arith.constant dense<0.000000e+00> : vector<32x256xf32>
    %11 = tpu.matmul %10, %9, %cst_8 {dimension_numbers = #tpu.dot_dimension_numbers<[1], [0], [0], [1], [0, 0, 1, 1], [], []>} : vector<32x32xbf16>, vector<32x256xbf16>, vector<32x256xf32> -> vector<32x256xf32>
    %c0_9 = arith.constant 0 : index
    %c0_10 = arith.constant 0 : index
    %12 = vector.load %arg5[%c0_9, %c0_10] : memref<32x1xf32, #tpu.memory_space<vmem>>, vector<32x1xf32>
    %13 = vector.broadcast %12 : vector<32x1xf32> to vector<32x256xf32>
    %14 = arith.addf %11, %13 : vector<32x256xf32>
    %cst_11 = arith.constant 0.000000e+00 : f32
    %15 = vector.broadcast %cst_11 : f32 to vector<32x256xf32>
    %16 = arith.maximumf %14, %15 : vector<32x256xf32>
    %17 = arith.truncf %16 : vector<32x256xf32> to vector<32x256xbf16>
    %c0_12 = arith.constant 0 : index
    %c0_13 = arith.constant 0 : index
    %18 = vector.load %arg6[%c0_12, %c0_13] : memref<32x32xbf16, #tpu.memory_space<vmem>>, vector<32x32xbf16>
    %cst_14 = arith.constant dense<0.000000e+00> : vector<32x256xf32>
    %19 = tpu.matmul %18, %17, %cst_14 {dimension_numbers = #tpu.dot_dimension_numbers<[1], [0], [0], [1], [0, 0, 1, 1], [], []>} : vector<32x32xbf16>, vector<32x256xbf16>, vector<32x256xf32> -> vector<32x256xf32>
    %c0_15 = arith.constant 0 : index
    %c0_16 = arith.constant 0 : index
    %20 = vector.load %arg7[%c0_15, %c0_16] : memref<32x1xf32, #tpu.memory_space<vmem>>, vector<32x1xf32>
    %21 = vector.broadcast %20 : vector<32x1xf32> to vector<32x256xf32>
    %22 = arith.addf %19, %21 : vector<32x256xf32>
    %cst_17 = arith.constant 0.000000e+00 : f32
    %23 = vector.broadcast %cst_17 : f32 to vector<32x256xf32>
    %24 = arith.maximumf %22, %23 : vector<32x256xf32>
    %25 = arith.truncf %24 : vector<32x256xf32> to vector<32x256xbf16>
    %c0_18 = arith.constant 0 : index
    %c0_19 = arith.constant 0 : index
    %26 = vector.load %arg8[%c0_18, %c0_19] : memref<4x32xbf16, #tpu.memory_space<vmem>>, vector<4x32xbf16>
    %cst_20 = arith.constant dense<0.000000e+00> : vector<4x256xf32>
    %27 = tpu.matmul %26, %25, %cst_20 {dimension_numbers = #tpu.dot_dimension_numbers<[1], [0], [0], [1], [0, 0, 1, 1], [], []>} : vector<4x32xbf16>, vector<32x256xbf16>, vector<4x256xf32> -> vector<4x256xf32>
    %c0_21 = arith.constant 0 : index
    %c0_22 = arith.constant 0 : index
    %28 = vector.load %arg9[%c0_21, %c0_22] : memref<4x1xf32, #tpu.memory_space<vmem>>, vector<4x1xf32>
    %29 = vector.broadcast %28 : vector<4x1xf32> to vector<4x256xf32>
    %30 = arith.addf %27, %29 : vector<4x256xf32>
    %cst_23 = arith.constant -5.000000e+00 : f32
    %cst_24 = arith.constant 5.000000e+00 : f32
    %31 = vector.broadcast %cst_23 : f32 to vector<4x256xf32>
    %32 = arith.maximumf %31, %30 : vector<4x256xf32>
    %33 = vector.broadcast %cst_24 : f32 to vector<4x256xf32>
    %34 = arith.minimumf %33, %32 : vector<4x256xf32>
    %cst_25 = arith.constant 1.000000e+00 : f32
    %35 = vector.broadcast %cst_25 : f32 to vector<4x256xf32>
    %36 = arith.mulf %34, %35 : vector<4x256xf32>
    %c0_26 = arith.constant 0 : index
    %c0_27 = arith.constant 0 : index
    %37 = vector.load %arg10[%c0_26, %c0_27] : memref<4x256xf32, #tpu.memory_space<vmem>>, vector<4x256xf32>
    tpu.vector_store %arg10[%c0_26, %c0_27], %36 {strides = array<i32>} : memref<4x256xf32, #tpu.memory_space<vmem>>, vector<4x256xf32>,
    return
  }
  func.func @transform_0(%arg0: i32) -> (i32, i32) {
    %c0_i32 = arith.constant 0 : i32
    %c0_i32_0 = arith.constant 0 : i32
    return %c0_i32, %arg0 : i32, i32
  }
  func.func @transform_1(%arg0: i32) -> (i32, i32) {
    %c0_i32 = arith.constant 0 : i32
    %c0_i32_0 = arith.constant 0 : i32
    %c0_i32_1 = arith.constant 0 : i32
    return %c0_i32, %c0_i32_0 : i32, i32
  }
  func.func @transform_2(%arg0: i32) -> (i32, i32) {
    %c0_i32 = arith.constant 0 : i32
    %c0_i32_0 = arith.constant 0 : i32
    %c0_i32_1 = arith.constant 0 : i32
    return %c0_i32, %c0_i32_0 : i32, i32
  }
  func.func @transform_3(%arg0: i32) -> (i32, i32) {
    %c0_i32 = arith.constant 0 : i32
    %c0_i32_0 = arith.constant 0 : i32
    %c0_i32_1 = arith.constant 0 : i32
    return %c0_i32, %c0_i32_0 : i32, i32
  }
  func.func @transform_4(%arg0: i32) -> (i32, i32) {
    %c0_i32 = arith.constant 0 : i32
    %c0_i32_0 = arith.constant 0 : i32
    %c0_i32_1 = arith.constant 0 : i32
    return %c0_i32, %c0_i32_0 : i32, i32
  }
  func.func @transform_5(%arg0: i32) -> (i32, i32) {
    %c0_i32 = arith.constant 0 : i32
    %c0_i32_0 = arith.constant 0 : i32
    %c0_i32_1 = arith.constant 0 : i32
    return %c0_i32, %c0_i32_0 : i32, i32
  }
  func.func @transform_6(%arg0: i32) -> (i32, i32) {
    %c0_i32 = arith.constant 0 : i32
    %c0_i32_0 = arith.constant 0 : i32
    %c0_i32_1 = arith.constant 0 : i32
    return %c0_i32, %c0_i32_0 : i32, i32
  }
  func.func @transform_7(%arg0: i32) -> (i32, i32) {
    %c0_i32 = arith.constant 0 : i32
    %c0_i32_0 = arith.constant 0 : i32
    %c0_i32_1 = arith.constant 0 : i32
    return %c0_i32, %c0_i32_0 : i32, i32
  }
  func.func @transform_8(%arg0: i32) -> (i32, i32) {
    %c0_i32 = arith.constant 0 : i32
    %c0_i32_0 = arith.constant 0 : i32
    %c0_i32_1 = arith.constant 0 : i32
    return %c0_i32, %c0_i32_0 : i32, i32
  }
  func.func @transform_9(%arg0: i32) -> (i32, i32) {
    %c0_i32 = arith.constant 0 : i32
    %c0_i32_0 = arith.constant 0 : i32
    return %c0_i32, %arg0 : i32, i32
  }
}

</mosaic_0001>

<bundles_post_ra>
// kernel: tpu_custom_call.1
= control target key start
LH: loop header
LB: loop body
LE: loop exit
PB: predicated region body
PF: predicated region fallthrough
CT: control target
= control target key end

     0   :  { %14 = vsyncpa [#allocation4], 0  ;;  %s1199_s0 = inlined_call_operand.vmem [shape: f32[16,512], index: 0, kind: input, shape index: {}]   ;;  %s1200_s1 = inlined_call_operand.vmem [shape: bf16[32,16], index: 1, kind: input, shape index: {}]   ;;  %s1201_s2 = inlined_call_operand.vmem [shape: f32[32,1], index: 2, kind: input, shape index: {}]   ;;  %s1202_s3 = inlined_call_operand.vmem [shape: bf16[32,32], index: 3, kind: input, shape index: {}]   ;;  %s1203_s4 = inlined_call_operand.vmem [shape: f32[32,1], index: 4, kind: input, shape index: {}]   ;;  %s1204_s5 = inlined_call_operand.vmem [shape: bf16[32,32], index: 5, kind: input, shape index: {}]   ;;  %s1205_s6 = inlined_call_operand.vmem [shape: f32[32,1], index: 6, kind: input, shape index: {}]   ;;  %s1206_s7 = inlined_call_operand.vmem [shape: bf16[4,32], index: 7, kind: input, shape index: {}]   ;;  %s1207_s8 = inlined_call_operand.vmem [shape: f32[4,1], index: 8, kind: input, shape index: {}]   ;;  %s1208_s9 = inlined_call_operand.hbm [shape: f32[4,512], index: 9, kind: output, shape index: {}]  }
   0x1   :  { %16 = vsyncpa [#allocation4 + $0x1], 0  ;;  %s1028_s30 = smov 0   ;;  %s1030_s10 = smov 0  }
   0x2   :  { %s1032_s11 = smov 0   ;;  %s1034_s12 = smov 0  }
   0x3 LB: > { %s834_s13 = sadd.s32 4294967295, %s974_s12   ;;  %s835_s14 = sadd.s32 4294967294, %s974_s12   ;;  %s974_s12 = sphi %s1034_s12, %s1216_s12   ;;  %s970_s11 = sphi %s1032_s11, %s1215_s11   ;;  %s966_s10 = sphi %s1030_s10, %s1214_s10   ;;  %s962_s30 = sphi %s1028_s30, %s1213_s30  }
   0x4   : > { %s1051_s15 = sadd.s32 1, %s974_s12   ;;  %s29_s16 = sadd.s32 1, %s970_s11 }
   0x5   : > { %s26_s17 = ssub.s32 %s974_s12, %s1051_s15  ;;  %p36_p0 = scmp.ne.s32.totalorder %s970_s11, %s966_s10 }
   0x6   : > { %p27_p1 = scmp.eq.s32.totalorder %s26_s17, 0  ;;  %p37_p2 = scmp.eq.s32.totalorder %s974_s12, 0 }
   0x7   : > { %p234_p3 = scmp.eq.s32.totalorder %s834_s13, 1  ;;  %p239_p4 = scmp.ne.s32.totalorder %s966_s10, %s962_s30 }
   0x8   : > { %s1064_s18 = scalar_select %p27_p1, %s970_s11, %s29_s16  }
   0x9   : > { %p38_p5 = por %p37_p2, %p36_p0  ;;  %p1066_p6 = por %p234_p3, %p36_p0 }
   0xa   : > { %p240_p7 = scmp.eq.s32.totalorder %s835_s14, 1  ;;  %p1209_p9 = scmp.ge.s32.totalorder %s974_s12, 2 }
   0xc   : > { %p1070_p8 = por %p240_p7, %p239_p4  ;;  %280 = sbr.rel (%p1209_p9) target bundleno = 23 (0x17), region = 48 }
  0x11   : > { %283 = sbr.rel (!%p38_p5) target bundleno = 23 (0x17), region = 52  ;;  %s285_s21 = sand.u32 (%p38_p5), 1, %s970_s11  }
  0x12   : > { %s864_s22 = sshll.u32 (%p38_p5), %s974_s12, 4  ;;  %s838_s23 = sshll.u32 (%p38_p5), %s285_s21, 5 }
  0x13   : > { %s290_s26 = scalar_lea.vmem (%p38_p5), %s1199_s0, %s864_s22  ;;  %s287_s27 = scalar_lea.vmem (%p38_p5), [#allocation2], %s838_s23 }
  0x14   : > { %v303_v0 = vld [vmem:[%s290_s26] sm:$0xff] (%p38_p5)  ;;  %v305_v1 = vld [vmem:[%s290_s26 + $0x8] sm:$0xff] (%p38_p5) }
  0x15   : > { %v307_v2 = vld [vmem:[%s290_s26 + $0x20] sm:$0xff] (%p38_p5)  ;;  %304 = vst [vmem:[%s287_s27] sm:$0xff] (%p38_p5), %v303_v0  ;;  %306 = vst [vmem:[%s287_s27 + $0x8] sm:$0xff] (%p38_p5), %v305_v1  ;;  %v309_v3 = vld [vmem:[%s290_s26 + $0x28] sm:$0xff] (%p38_p5) }
  0x16   : > { %308 = vst [vmem:[%s287_s27 + $0x10] sm:$0xff] %v307_v2  ;;  %310 = vst [vmem:[%s287_s27 + $0x18] sm:$0xff] %v309_v3 }
  0x17 PF: > { %p841_p10 = scmp.ge.s32.totalorder %s974_s12, 1  ;;  %p315_p11 = scmp.lt.s32.totalorder %s974_s12, 3 }
  0x19   : > { %p316_p12 = pnand %p841_p10, %p315_p11 }
  0x1a   : > { %s1085_s28 = sand.u32 (!%p316_p12), 1, %s966_s10   ;;  %s865_s27 = sshll.u32 (!%p316_p12), %s834_s13, 7 }
  0x1b   : > { %319 = sbr.rel (%p316_p12) target bundleno = 917 (0x395), region = 75  ;;  %s842_s29 = sshll.u32 (!%p316_p12), %s1085_s28, 5 }
  0x1c   : > { %s324_s17 = scalar_lea.vmem (!%p316_p12), [#allocation2], %s842_s29  ;;  %s843_s26 = sshll.u32 (!%p316_p12), %s1085_s28, 3 }
  0x1d   : > { %s356_s29 = scalar_lea.vmem (!%p316_p12), [#allocation3], %s843_s26  ;;  %s768_s21 = scalar_lea.hbm (!%p316_p12), %s1208_s9, %s865_s27 }
  0x1e   : > { %s770_s14 = sshll.u32 (!%p316_p12), %s356_s29, 4  ;;  %s756_s22 = scalar_lea.sflag (!%p316_p12), [#allocation4], %s1085_s28  ;;  %s771_s14 = int_to_ptr.vmem [resolvable:$true] %s770_s14 }
  0x1f   : > { %s914_s23 = scalar_lea.vmem (!%p316_p12), %s771_s14, 128  ;;  %s977_s24 = smov (!%p316_p12), [#allocation3]  }
  0x20   : > { %v976_v4 = vmov 0   ;;  %v372_v5 = vld [vmem:[%s1201_s2 + $0x10] sm:$0xff]  ;;  %v361_v6 = vld [vmem:[%s324_s17 + $0x8] sm:$0xff]  ;;  %v363_v7 = vld [vmem:[%s324_s17 + $0x18] sm:$0xff]  ;;  %vm404_vm0 = vcmask 130048   ;;  %vm514_vm1 = vcmask 261120   ;;  %p915_p13 = scmp.ne.s32.totalorder %s771_s14, %s914_s23 }
  0x21   : > { %443 = vmatprep.mubr.bf16.mxu0 %v976_v4  ;;  %906 = vset.pattern.permute.xlu0 %v976_v4  ;;  %v360_v8 = vld [vmem:[%s324_s17] sm:$0xff]  ;;  %v365_v9 = vpack.c.bf16 %v363_v7, %v361_v6  ;;  %v362_v10 = vld [vmem:[%s324_s17 + $0x10] sm:$0xff]  ;;  %v373_v11 = vld [vmem:[%s1201_s2 + $0x18] sm:$0xff]  ;;  %s918_s13 = sshll.u32 %s977_s24, 4  ;;  %s919_s13 = int_to_ptr.vmem [resolvable:$false] %s918_s13 }
  0x22   : > { %907 = vset.pattern.permute.xlu1 %v976_v4  ;;  %553 = vmatprep.mubr.bf16.mxu1 %v976_v4  ;;  %v370_v12 = vld [vmem:[%s1201_s2] sm:$0xff]  ;;  %v364_v13 = vpack.c.bf16 %v362_v10, %v360_v8  ;;  %v371_v15 = vld [vmem:[%s1201_s2 + $0x8] sm:$0xff]  ;;  %v482_v16 = vld [vmem:[%s1203_s4 + $0x10] sm:$0xff]  ;;  %p916_p0 = pnand %p915_p13, %p1066_p6  ;;  %s920_s25 = scalar_lea.vmem %s919_s13, 256 }
  0x23   : > { %386 = vperm.xlu0 %906, %v372_v5   ;;  %376 = vperm.xlu1 %907, %v370_v12   ;;  %v908_v14 = vld [vmem:[%s1200_s1] sm:$0xff]   ;;  %v483_v17 = vld [vmem:[%s1203_s4 + $0x18] sm:$0xff]  ;;  %v909_v19 = vld [vmem:[%s1200_s1 + $0x8] sm:$0xff]   ;;  %p921_p2 = scmp.lt.s32.totalorder %s771_s14, %s919_s13  ;;  %p922_p3 = scmp.lt.s32.totalorder %s920_s25, %s914_s23 }
  0x24   : > { %425 = vmatprep.subr.bf16.mxu0 %v365_v9  ;;  %v480_v18 = vld [vmem:[%s1203_s4] sm:$0xff]  ;;  %v481_v20 = vld [vmem:[%s1203_s4 + $0x8] sm:$0xff]  ;;  %v592_v21 = vld [vmem:[%s1205_s6 + $0x10] sm:$0xff]  ;;  %p917_p1 = pneg %p916_p0 }
  0x25   : > { %426 = vmatpush1.bf16.msra.mxu0 %v364_v13  ;;  %v593_v22 = vld [vmem:[%s1205_s6 + $0x18] sm:$0xff]  ;;  %v590_v23 = vld [vmem:[%s1205_s6] sm:$0xff]  ;;  %v591_v24 = vld [vmem:[%s1205_s6 + $0x8] sm:$0xff]  ;;  %p923_p4 = por %p922_p3, %p921_p2 }
  0x26   : > { %v696_v25 = vld [vmem:[%s1207_s8] sm:$0xf]  ;;  %v911_v59 = vld [vmem:[%s1202_s3 + $0x8] sm:$0xff]  }
  0x27   : > { %391 = vperm.xlu0 %906, %v373_v11   ;;  %381 = vperm.xlu1 %907, %v371_v15   ;;  %v910_v58 = vld [vmem:[%s1202_s3] sm:$0xff]   ;;  %p924_p5 = pnand %p923_p4, %p917_p1 }
  0x28   : > { %846 = vmatmul.mubr.msk.bf16.vlgmr.msra.gmra.mxu0 %vm404_vm0, %v908_v14 }
  0x29   : > { %453 = vmatprep.mubr.bf16.mxu0 %v976_v4 }
  0x2b   : > { %496 = vperm.xlu0 %906, %v482_v16   ;;  %501 = vperm.xlu1 %907, %v483_v17  }
  0x2f   : > { %486 = vperm.xlu0 %906, %v480_v18   ;;  %491 = vperm.xlu1 %907, %v481_v20  }
  0x30   : > { %847 = vmatmul.mubr.msk.bf16.gmra.mxu0 %vm404_vm0, %v909_v19 }
  0x31   : > { %662 = vmatprep.mubr.bf16.mxu0 %v976_v4 }
  0x33   : > { %606 = vperm.xlu0 %906, %v592_v21   ;;  %611 = vperm.xlu1 %907, %v593_v22  }
  0x37   : > { %596 = vperm.xlu0 %906, %v590_v23   ;;  %601 = vperm.xlu1 %907, %v591_v24  }
  0x3b   : > { %699 = vperm.xlu0 %906, %v696_v25  }
  0x9e   : > { %v387_v29 = vpop.permute.xlu0 %386  ;;  %v377_v30 = vpop.permute.xlu1 %376 }
  0xa2   : > { %v392_v34 = vpop.permute.xlu0 %391  ;;  %v382_v35 = vpop.permute.xlu1 %381 }
  0xa6   : > { %v502_v63 = vpop.permute.xlu1 %501  ;;  %v497_v1 = vpop.permute.xlu0 %496 }
  0xaa   : > { %v492_v5 = vpop.permute.xlu1 %491  ;;  %v487_v10 = vpop.permute.xlu0 %486 }
  0xe8   : > { %v445_v26 = vpop.f32.mrf.mxu0 }
  0xe9   : > { %v446_v49 = vadd.f32 %v445_v26, %v377_v30 }
  0xea   : > { %v447_v27 = vpop.f32.mrf.mxu0 }
  0xeb   : > { %v448_v42 = vadd.f32 %v447_v27, %v377_v30  ;;  %v464_v56 = vmax.f32 %v446_v49, 0.0  ;;  %v913_v30 = vld [vmem:[%s1204_s5 + $0x8] sm:$0xff]  }
  0xec   : > { %v449_v28 = vpop.f32.mrf.mxu0 }
  0xed   : > { %v450_v44 = vadd.f32 %v449_v28, %v382_v35  ;;  %v465_v51 = vmax.f32 %v448_v42, 0.0 }
  0xee   : > { %v451_v31 = vpop.f32.mrf.mxu0 }
  0xef   : > { %v452_v37 = vadd.f32 %v451_v31, %v382_v35  ;;  %v466_v53 = vmax.f32 %v450_v44, 0.0 }
  0xf0   : > { %v455_v32 = vpop.f32.mrf.mxu0 }
  0xf1   : > { %v456_v40 = vadd.f32 %v455_v32, %v387_v29  ;;  %v467_v46 = vmax.f32 %v452_v37, 0.0  ;;  %v472_v57 = vpack.c.bf16 %v466_v53, %v464_v56 }
  0xf2   : > { %v457_v33 = vpop.f32.mrf.mxu0 }
  0xf3   : > { %v458_v38 = vadd.f32 %v457_v33, %v387_v29  ;;  %v468_v50 = vmax.f32 %v456_v40, 0.0  ;;  %v473_v55 = vpack.c.bf16 %v467_v46, %v465_v51  ;;  %v912_v29 = vld [vmem:[%s1204_s5] sm:$0xff]  }
  0xf4   : > { %v459_v36 = vpop.f32.mrf.mxu0 }
  0xf5   : > { %v460_v39 = vadd.f32 %v459_v36, %v392_v34  ;;  %v469_v47 = vmax.f32 %v458_v38, 0.0  ;;  %v607_v36 = vpop.permute.xlu0 %606 }
  0xf6   : > { %v461_v41 = vpop.f32.mrf.mxu0 }
  0xf7   : > { %v462_v43 = vadd.f32 %v461_v41, %v392_v34  ;;  %v470_v45 = vmax.f32 %v460_v39, 0.0  ;;  %v612_v34 = vpop.permute.xlu1 %611 }
  0xf9   : > { %v471_v48 = vmax.f32 %v462_v43, 0.0  ;;  %v474_v54 = vpack.c.bf16 %v470_v45, %v468_v50 }
  0xfb   : > { %v475_v52 = vpack.c.bf16 %v471_v48, %v469_v47  ;;  %v602_v39 = vpop.permute.xlu1 %601 }
  0xfd   : > { %533 = vmatprep.subr.bf16.mxu1 %v475_v52 }
  0xfe   : > { %534 = vmatpush1.bf16.msra.mxu1 %v474_v54 }
  0xff   : > { %535 = vmatprep.subr.bf16.mxu1 %v473_v55 }
 0x102   : > { %536 = vmatpush1.bf16.msra.mxu1 %v472_v57 }
 0x105   : > { %850 = vmatmul.mubr.msk.bf16.vlgmr.msra.gmra.mxu1 %vm514_vm1, %v910_v58 }
 0x106   : > { %563 = vmatprep.mubr.bf16.mxu1 %v976_v4 }
 0x10d   : > { %851 = vmatmul.mubr.msk.bf16.gmra.mxu1 %vm514_vm1, %v911_v59 }
 0x10e   : > { %737 = vmatprep.mubr.bf16.mxu1 %v976_v4 }
 0x1c5   : > { %v555_v60 = vpop.f32.mrf.mxu1 }
 0x1c6   : > { %v556_v20 = vadd.f32 %v555_v60, %v487_v10 }
 0x1c7   : > { %v557_v61 = vpop.f32.mrf.mxu1 }
 0x1c8   : > { %v558_v13 = vadd.f32 %v557_v61, %v487_v10  ;;  %v574_v27 = vmax.f32 %v556_v20, 0.0 }
 0x1c9   : > { %v559_v62 = vpop.f32.mrf.mxu1 }
 0x1ca   : > { %v560_v15 = vadd.f32 %v559_v62, %v492_v5  ;;  %v575_v22 = vmax.f32 %v558_v13, 0.0  ;;  %v695_v62 = vld [vmem:[%s1206_s7] sm:$0x3] }
 0x1cb   : > { %v561_v0 = vpop.f32.mrf.mxu1 }
 0x1cc   : > { %v562_v7 = vadd.f32 %v561_v0, %v492_v5  ;;  %v576_v24 = vmax.f32 %v560_v15, 0.0 }
 0x1cd   : > { %v565_v2 = vpop.f32.mrf.mxu1 }
 0x1ce   : > { %v566_v11 = vadd.f32 %v565_v2, %v497_v1  ;;  %v577_v17 = vmax.f32 %v562_v7, 0.0  ;;  %v582_v28 = vpack.c.bf16 %v576_v24, %v574_v27 }
 0x1cf   : > { %v567_v3 = vpop.f32.mrf.mxu1 }
 0x1d0   : > { %v568_v8 = vadd.f32 %v567_v3, %v497_v1  ;;  %v578_v21 = vmax.f32 %v566_v11, 0.0  ;;  %v583_v26 = vpack.c.bf16 %v577_v17, %v575_v22 }
 0x1d1   : > { %v569_v6 = vpop.f32.mrf.mxu1 }
 0x1d2   : > { %v570_v9 = vadd.f32 %v569_v6, %v502_v63  ;;  %v579_v18 = vmax.f32 %v568_v8, 0.0 }
 0x1d3   : > { %v571_v12 = vpop.f32.mrf.mxu1 }
 0x1d4   : > { %v572_v14 = vadd.f32 %v571_v12, %v502_v63  ;;  %v580_v16 = vmax.f32 %v570_v9, 0.0 }
 0x1d6   : > { %v581_v19 = vmax.f32 %v572_v14, 0.0  ;;  %v584_v25 = vpack.c.bf16 %v580_v16, %v578_v21 }
 0x1d8   : > { %v585_v23 = vpack.c.bf16 %v581_v19, %v579_v18 }
 0x1da   : > { %642 = vmatprep.subr.bf16.mxu0 %v585_v23 }
 0x1db   : > { %643 = vmatpush1.bf16.msra.mxu0 %v584_v25 }
 0x1dc   : > { %644 = vmatprep.subr.bf16.mxu0 %v583_v26 }
 0x1df   : > { %645 = vmatpush1.bf16.msra.mxu0 %v582_v28 }
 0x1e2   : > { %854 = vmatmul.mubr.msk.bf16.vlgmr.msra.gmra.mxu0 %vm514_vm1, %v912_v29 }
 0x1e3   : > { %672 = vmatprep.mubr.bf16.mxu0 %v976_v4  ;;  %v597_v4 = vpop.permute.xlu0 %596 }
 0x1e7   : > { %v700_v63 = vpop.permute.xlu0 %699 }
 0x1ea   : > { %855 = vmatmul.mubr.msk.bf16.gmra.mxu0 %vm514_vm1, %v913_v30 }
 0x2a2   : > { %v664_v31 = vpop.f32.mrf.mxu0 }
 0x2a3   : > { %v665_v53 = vadd.f32 %v664_v31, %v597_v4 }
 0x2a4   : > { %v666_v32 = vpop.f32.mrf.mxu0 }
 0x2a5   : > { %v667_v46 = vadd.f32 %v666_v32, %v597_v4  ;;  %v683_v60 = vmax.f32 %v665_v53, 0.0 }
 0x2a6   : > { %v668_v33 = vpop.f32.mrf.mxu0 }
 0x2a7   : > { %v669_v48 = vadd.f32 %v668_v33, %v602_v39  ;;  %v684_v55 = vmax.f32 %v667_v46, 0.0 }
 0x2a8   : > { %v670_v35 = vpop.f32.mrf.mxu0 }
 0x2a9   : > { %v671_v41 = vadd.f32 %v670_v35, %v602_v39  ;;  %v685_v57 = vmax.f32 %v669_v48, 0.0 }
 0x2aa   : > { %v674_v37 = vpop.f32.mrf.mxu0 }
 0x2ab   : > { %v675_v44 = vadd.f32 %v674_v37, %v607_v36  ;;  %v686_v50 = vmax.f32 %v671_v41, 0.0  ;;  %v691_v61 = vpack.c.bf16 %v685_v57, %v683_v60 }
 0x2ac   : > { %v676_v38 = vpop.f32.mrf.mxu0 }
 0x2ad   : > { %v677_v42 = vadd.f32 %v676_v38, %v607_v36  ;;  %v687_v54 = vmax.f32 %v675_v44, 0.0  ;;  %v692_v59 = vpack.c.bf16 %v686_v50, %v684_v55 }
 0x2ae   : > { %v678_v40 = vpop.f32.mrf.mxu0 }
 0x2af   : > { %v679_v43 = vadd.f32 %v678_v40, %v612_v34  ;;  %v688_v51 = vmax.f32 %v677_v42, 0.0 }
 0x2b0   : > { %v680_v45 = vpop.f32.mrf.mxu0 }
 0x2b1   : > { %v681_v47 = vadd.f32 %v680_v45, %v612_v34  ;;  %v689_v49 = vmax.f32 %v679_v43, 0.0 }
 0x2b3   : > { %v690_v52 = vmax.f32 %v681_v47, 0.0  ;;  %v693_v58 = vpack.c.bf16 %v689_v49, %v687_v54 }
 0x2b5   : > { %v694_v56 = vpack.c.bf16 %v690_v52, %v688_v51 }
 0x2b7   : > { %717 = vmatprep.subr.bf16.mxu1 %v694_v56 }
 0x2b8   : > { %718 = vmatpush1.bf16.msra.mxu1 %v693_v58 }
 0x2b9   : > { %719 = vmatprep.subr.bf16.mxu1 %v692_v59 }
 0x2bc   : > { %720 = vmatpush1.bf16.msra.mxu1 %v691_v61 }
 0x2bf   : > { %856 = vmatmul.mubr.msk.bf16.vlgmr.msra.gmra.mxu1 %vm514_vm1, %v695_v62 }
 0x37f   : > { %v739_v0 = vpop.f32.mrf.mxu1 }
 0x380   : > { %v740_v1 = vadd.f32 %v739_v0, %v700_v63 }
 0x381   : > { %v741_v2 = vpop.f32.mrf.mxu1 }
 0x382   : > { %v742_v3 = vadd.f32 %v741_v2, %v700_v63  ;;  %v857_v6 = vclamps-f32 %v740_v1, 5.0 }
 0x383   : > { %v743_v5 = vpop.f32.mrf.mxu1 }
 0x384   : > { %v858_v7 = vclamps-f32 %v742_v3, 5.0 }
 0x385   : > { %v744_v8 = vpop.f32.mrf.mxu1 }
 0x386   : > { %v752_v9 = vcombine.low %v857_v6, %v858_v7 }
 0x388   : > { %754 = vst [vmem:[%s356_s29] sm:$0xff] %v752_v9 }
 0x389   : > { %927 = shalt.err (!%p924_p5)
}
 0x38a   : > { %s928_s26 = scalar_lea.hbm %s768_s21, 128  ;;  %s932_s29 = scalar_lea.hbm %s1208_s9, 256 }
 0x38b   : > { %p929_p7 = scmp.ne.s32.totalorder %s768_s21, %s928_s26  ;;  %p933_p12 = scmp.lt.s32.totalorder %s768_s21, %s1208_s9 }
 0x38c   : > { %p934_p13 = scmp.lt.s32.totalorder %s932_s29, %s928_s26 }
 0x38d   : > { %p930_p10 = pnand %p929_p7, %p1066_p6 }
 0x38e   : > { %p935_p0 = por %p934_p13, %p933_p12 }
 0x38f   : > { %p931_p11 = pneg %p930_p10 }
 0x391   : > { %p936_p9 = pnand %p935_p0, %p931_p11 }
 0x393   : > { %939 = shalt.err (!%p936_p9)
}
 0x394   : > { %866 = dma.vmem_to_hbm [thread:$0]  (%p1066_p6), %s771_s14, 128, %s768_s21, %s756_s22  }
 0x395 PF: > { %s782_s23 = sand.u32 1, %s962_s30   ;;  %p1212_p1 = scmp.ge.s32.totalorder %s974_s12, 2 }
 0x396   : > { %s783_s24 = scalar_lea.sflag [#allocation4], %s782_s23 }
 0x397   : > { %p869_p2 = pnand %p1212_p1, %p1070_p8 }
 0x399   : > { %p870_p3 = pneg %p869_p2 }
 0x39b   : > { %957 = dma.done.wait (%p870_p3), %s783_s24, 128  }
 0x39c   : > { %959 = vsyncadd (%p870_p3), %s783_s24, 4294967168  ;;  %p19_p9 = scmp.ge.s32.totalorder %s1051_s15, 4   ;;  %s1213_s30 = smov %s966_s10 }
 0x39d   : > { %s1214_s10 = smov %s970_s11  ;;  %s1215_s11 = smov %s1064_s18 }
 0x39e   : > { %s1216_s12 = smov %s1051_s15  ;;  %21 = sbr.rel (!%p19_p9) target bundleno = 3 (0x3), region = 119 }
 0x3a3   :  { %788 = vsyncpa [#allocation4], 1 }
 0x3a4   :  { %790 = vsyncpa [#allocation4 + $0x1], 1 }

</bundles_post_ra>
